<compile_context>
chip_gen: v7x
topology: tpu7x:2x2x1
jax: 0.10.0
libtpu: 0.0.40
codegen_flags: <defaults>
</compile_context>

<pallas_src>
import functools

import jax
import jax.numpy as jnp
from jax.experimental import pallas as pl
from jax.experimental.pallas import tpu as pltpu

HEAD_PAD = 8  # presence(1) + location(3) + size(2) = 6, padded to 8 rows.


def _round_up(n, m):
    return ((n + m - 1) // m) * m


def _tiled_bytes(shape):
    """f32 HBM footprint of a 2-D array under the (8,128) tiled layout."""
    r, c = shape
    return 4 * _round_up(r, 8) * _round_up(c, 128)


def _mlp_kernel(xt_ref,
                w1_ref, b1_ref,
                w2_ref, b2_ref,
                w3_ref, b3_ref,
                wh_ref, bh_ref,
                yt_ref):
    # xt: [F, TILE_B] -- batch in lanes.
    xt = xt_ref[...]

    # fc_layers: Linear -> ReLU -> (Dropout=id) -> Linear -> ReLU -> (Dropout=id)
    #            -> Linear -> ReLU, all computed transposed: h = relu(W @ x^T + b).
    h = jnp.dot(w1_ref[...], xt, preferred_element_type=jnp.float32) + b1_ref[...]
    h = jnp.maximum(h, 0.0)
    h = jnp.dot(w2_ref[...], h, preferred_element_type=jnp.float32) + b2_ref[...]
    h = jnp.maximum(h, 0.0)
    h = jnp.dot(w3_ref[...], h, preferred_element_type=jnp.float32) + b3_ref[...]
    h = jnp.maximum(h, 0.0)

    # Fused heads: rows = [presence(1) | location(3) | size(2) | pad(2)].
    yt_ref[...] = (jnp.dot(wh_ref[...], h, preferred_element_type=jnp.float32)
                   + bh_ref[...])


@functools.partial(jax.jit, static_argnames=("tile_b",))
def fdem1d_inversion_forward(x, params, *, tile_b=None):
    """x: [B, num_freqs*2] float32. params: dict from init_params.

    Returns (presence [B,1] sigmoid, location [B,3], size [B,2]).
    """
    B, F = x.shape
    H = params["w1"].shape[0]
    half = params["w3"].shape[0]
    HP = params["wh"].shape[0]  # padded fused-head height (== HEAD_PAD)

    # Batch tile lives in the lane dimension -> multiple of 128.  Cap at 8192:
    # per-step VMEM stays at a few MiB on every generation (incl. v7x) while
    # per-grid-step overhead (~0.35 us) is amortized over >=0.5 MiB of traffic.
    if tile_b is None:
        tile_b = min(8192, _round_up(B, 128))
    tile_b = max(128, _round_up(int(tile_b), 128))
    n_tiles = (B + tile_b - 1) // tile_b  # ragged tail handled by block clipping

    # Batch-in-lanes: kernel sees x^T [F, B] and writes y^T [HP, B].
    xt = x.T

    xt_spec = pl.BlockSpec((F, tile_b), lambda i: (0, i))
    yt_spec = pl.BlockSpec((HP, tile_b), lambda i: (0, i))

    def resident(arr):
        # Same block index every step -> weight/bias stays resident in VMEM.
        return pl.BlockSpec(arr.shape, lambda i: (0, 0))

    weight_arrays = [params["w1"], params["b1"],
                     params["w2"], params["b2"],
                     params["w3"], params["b3"],
                     params["wh"], params["bh"]]

    in_specs = [xt_spec] + [resident(a) for a in weight_arrays]

    # --- VMEM budget: double-buffered x/y blocks + intermediates + weights ---
    weight_bytes = sum(4 * a.shape[0] * a.shape[1] for a in weight_arrays)
    io_bytes = 4 * tile_b * (2 * F + 2 * HP)            # double-buffered blocks
    inter_bytes = 4 * tile_b * (H + H + half)           # staged activations
    vmem_limit = int(min(64 << 20,
                         max(16 << 20,
                             2 * (io_bytes + inter_bytes + 2 * weight_bytes))))

    # --- Cost estimate with real (8,128)-tiled HBM footprints ---
    flops = 2 * (n_tiles * tile_b) * (F * H + H * H + H * half + half * HP)
    bytes_accessed = (_tiled_bytes((F, B)) + _tiled_bytes((HP, B))
                      + sum(_tiled_bytes(a.shape) for a in weight_arrays))
    cost = pl.CostEstimate(flops=flops, transcendentals=0,
                           bytes_accessed=bytes_accessed)

    yt = pl.pallas_call(
        _mlp_kernel,
        out_shape=jax.ShapeDtypeStruct((HP, B), jnp.float32),
        grid_spec=pltpu.PrefetchScalarGridSpec(
            num_scalar_prefetch=0,
            grid=(n_tiles,),
            in_specs=in_specs,
            out_specs=yt_spec,
        ),
        compiler_params=pltpu.CompilerParams(
            # "parallel" lets the batch axis shard across both v7x TensorCores;
            # harmless single-TC no-op on v5e/v6e.
            dimension_semantics=("parallel",),
            vmem_limit_bytes=vmem_limit,
        ),
        cost_estimate=cost,
    )(xt, *weight_arrays)

    presence = jax.nn.sigmoid(yt[0:1, :]).T   # [B, 1]
    location = yt[1:4, :].T                   # [B, 3]
    size = yt[4:6, :].T                       # [B, 2]
    return presence, location, size


def init_params(num_freqs, hidden_size, key):
    """PyTorch-style uniform(-1/sqrt(fan_in), 1/sqrt(fan_in)) init.

    Weights are kept in PyTorch's [out, in] layout (the kernel computes
    W @ x^T); biases are [out, 1].  The three heads are fused and zero-padded
    to HEAD_PAD output rows.
    """
    input_size = num_freqs * 2
    half = hidden_size // 2

    def linear(key, fan_in, fan_out):
        kw, kb = jax.random.split(key)
        bound = 1.0 / jnp.sqrt(jnp.float32(fan_in))
        w = jax.random.uniform(kw, (fan_out, fan_in), jnp.float32, -bound, bound)
        b = jax.random.uniform(kb, (fan_out, 1), jnp.float32, -bound, bound)
        return w, b

    keys = jax.random.split(key, 6)
    w1, b1 = linear(keys[0], input_size, hidden_size)
    w2, b2 = linear(keys[1], hidden_size, hidden_size)
    w3, b3 = linear(keys[2], hidden_size, half)
    wp, bp = linear(keys[3], half, 1)   # presence head
    wl, bl = linear(keys[4], half, 3)   # location head
    ws, bs = linear(keys[5], half, 2)   # size head

    # Fuse the three heads into one [HEAD_PAD, half] matmul (zero-padded rows).
    pad_w = jnp.zeros((HEAD_PAD - 6, half), jnp.float32)
    pad_b = jnp.zeros((HEAD_PAD - 6, 1), jnp.float32)
    wh = jnp.concatenate([wp, wl, ws, pad_w], axis=0)
    bh = jnp.concatenate([bp, bl, bs, pad_b], axis=0)

    return {
        "w1": w1, "b1": b1,
        "w2": w2, "b2": b2,
        "w3": w3, "b3": b3,
        "wh": wh, "bh": bh,
    }


def _reference_forward(x, params):
    """Pure-JAX reference for sanity checking (same transposed math)."""
    xt = x.T
    h = jnp.maximum(params["w1"] @ xt + params["b1"], 0.0)
    h = jnp.maximum(params["w2"] @ h + params["b2"], 0.0)
    h = jnp.maximum(params["w3"] @ h + params["b3"], 0.0)
    y = params["wh"] @ h + params["bh"]
    return jax.nn.sigmoid(y[0:1, :]).T, y[1:4, :].T, y[4:6, :].T


if __name__ == "__main__":
    num_freqs = 8          # -> input_size = 16
    hidden_size = 32       # -> heads operate on hidden_size // 2 = 16
    batch = 10             # not a multiple of 128 -> exercises the clipped tail block

    key = jax.random.PRNGKey(0)
    kx, kp = jax.random.split(key)
    x = jax.random.normal(kx, (batch, num_freqs * 2), dtype=jnp.float32)
    params = init_params(num_freqs, hidden_size, kp)

    presence, location, size = fdem1d_inversion_forward(x, params)
    jax.block_until_ready((presence, location, size))

    # Sanity check against a pure-JAX reference (also validates tail masking).
    ref_p, ref_l, ref_s = _reference_forward(x, params)
    assert presence.shape == (batch, 1)
    assert location.shape == (batch, 3)
    assert size.shape == (batch, 2)
    assert jnp.allclose(presence, ref_p, atol=1e-5)
    assert jnp.allclose(location, ref_l, atol=1e-5)
    assert jnp.allclose(size, ref_s, atol=1e-5)

    print("KERNEL_OK")
</pallas_src>

<mosaic_0001>
module attributes {stable_mosaic.version = 11 : i64} {
  func.func @_mlp_kernel(%arg0: i32, %arg1: memref<16x128xf32, #tpu.memory_space<vmem>>, %arg2: memref<32x16xf32, #tpu.memory_space<vmem>>, %arg3: memref<32x1xf32, #tpu.memory_space<vmem>>, %arg4: memref<32x32xf32, #tpu.memory_space<vmem>>, %arg5: memref<32x1xf32, #tpu.memory_space<vmem>>, %arg6: memref<16x32xf32, #tpu.memory_space<vmem>>, %arg7: memref<16x1xf32, #tpu.memory_space<vmem>>, %arg8: memref<8x16xf32, #tpu.memory_space<vmem>>, %arg9: memref<8x1xf32, #tpu.memory_space<vmem>>, %arg10: memref<8x128xf32, #tpu.memory_space<vmem>>) attributes {dimension_semantics = [#tpu.dimension_semantics<parallel>], iteration_bounds = array<i64: 1>, scalar_prefetch = 0 : i64, scratch_operands = 0 : i64, tpu.core_type = #tpu.core_type<tc>, window_params = [{transform_indices = @transform_0, window_bounds = array<i64: 16, 128>}, {pipeline_mode = #tpu.pipeline_mode<synchronous>, transform_indices = @transform_1, window_bounds = array<i64: 32, 16>}, {pipeline_mode = #tpu.pipeline_mode<synchronous>, transform_indices = @transform_2, window_bounds = array<i64: 32, 1>}, {pipeline_mode = #tpu.pipeline_mode<synchronous>, transform_indices = @transform_3, window_bounds = array<i64: 32, 32>}, {pipeline_mode = #tpu.pipeline_mode<synchronous>, transform_indices = @transform_4, window_bounds = array<i64: 32, 1>}, {pipeline_mode = #tpu.pipeline_mode<synchronous>, transform_indices = @transform_5, window_bounds = array<i64: 16, 32>}, {pipeline_mode = #tpu.pipeline_mode<synchronous>, transform_indices = @transform_6, window_bounds = array<i64: 16, 1>}, {pipeline_mode = #tpu.pipeline_mode<synchronous>, transform_indices = @transform_7, window_bounds = array<i64: 8, 16>}, {pipeline_mode = #tpu.pipeline_mode<synchronous>, transform_indices = @transform_8, window_bounds = array<i64: 8, 1>}, {transform_indices = @transform_9, window_bounds = array<i64: 8, 128>}]} {
    %c0 = arith.constant 0 : index
    %c0_0 = arith.constant 0 : index
    %0 = vector.load %arg1[%c0, %c0_0] : memref<16x128xf32, #tpu.memory_space<vmem>>, vector<16x128xf32>
    %c0_1 = arith.constant 0 : index
    %c0_2 = arith.constant 0 : index
    %1 = vector.load %arg2[%c0_1, %c0_2] : memref<32x16xf32, #tpu.memory_space<vmem>>, vector<32x16xf32>
    %cst = arith.constant dense<0.000000e+00> : vector<32x128xf32>
    %2 = tpu.matmul %1, %0, %cst {dimension_numbers = #tpu.dot_dimension_numbers<[1], [0], [0], [1], [0, 0, 1, 1], [], []>} : vector<32x16xf32>, vector<16x128xf32>, vector<32x128xf32> -> vector<32x128xf32>
    %c0_3 = arith.constant 0 : index
    %c0_4 = arith.constant 0 : index
    %3 = vector.load %arg3[%c0_3, %c0_4] : memref<32x1xf32, #tpu.memory_space<vmem>>, vector<32x1xf32>
    %4 = vector.broadcast %3 : vector<32x1xf32> to vector<32x128xf32>
    %5 = arith.addf %2, %4 : vector<32x128xf32>
    %cst_5 = arith.constant 0.000000e+00 : f32
    %6 = vector.broadcast %cst_5 : f32 to vector<32x128xf32>
    %7 = arith.maximumf %5, %6 : vector<32x128xf32>
    %c0_6 = arith.constant 0 : index
    %c0_7 = arith.constant 0 : index
    %8 = vector.load %arg4[%c0_6, %c0_7] : memref<32x32xf32, #tpu.memory_space<vmem>>, vector<32x32xf32>
    %cst_8 = arith.constant dense<0.000000e+00> : vector<32x128xf32>
    %9 = tpu.matmul %8, %7, %cst_8 {dimension_numbers = #tpu.dot_dimension_numbers<[1], [0], [0], [1], [0, 0, 1, 1], [], []>} : vector<32x32xf32>, vector<32x128xf32>, vector<32x128xf32> -> vector<32x128xf32>
    %c0_9 = arith.constant 0 : index
    %c0_10 = arith.constant 0 : index
    %10 = vector.load %arg5[%c0_9, %c0_10] : memref<32x1xf32, #tpu.memory_space<vmem>>, vector<32x1xf32>
    %11 = vector.broadcast %10 : vector<32x1xf32> to vector<32x128xf32>
    %12 = arith.addf %9, %11 : vector<32x128xf32>
    %cst_11 = arith.constant 0.000000e+00 : f32
    %13 = vector.broadcast %cst_11 : f32 to vector<32x128xf32>
    %14 = arith.maximumf %12, %13 : vector<32x128xf32>
    %c0_12 = arith.constant 0 : index
    %c0_13 = arith.constant 0 : index
    %15 = vector.load %arg6[%c0_12, %c0_13] : memref<16x32xf32, #tpu.memory_space<vmem>>, vector<16x32xf32>
    %cst_14 = arith.constant dense<0.000000e+00> : vector<16x128xf32>
    %16 = tpu.matmul %15, %14, %cst_14 {dimension_numbers = #tpu.dot_dimension_numbers<[1], [0], [0], [1], [0, 0, 1, 1], [], []>} : vector<16x32xf32>, vector<32x128xf32>, vector<16x128xf32> -> vector<16x128xf32>
    %c0_15 = arith.constant 0 : index
    %c0_16 = arith.constant 0 : index
    %17 = vector.load %arg7[%c0_15, %c0_16] : memref<16x1xf32, #tpu.memory_space<vmem>>, vector<16x1xf32>
    %18 = vector.broadcast %17 : vector<16x1xf32> to vector<16x128xf32>
    %19 = arith.addf %16, %18 : vector<16x128xf32>
    %cst_17 = arith.constant 0.000000e+00 : f32
    %20 = vector.broadcast %cst_17 : f32 to vector<16x128xf32>
    %21 = arith.maximumf %19, %20 : vector<16x128xf32>
    %c0_18 = arith.constant 0 : index
    %c0_19 = arith.constant 0 : index
    %22 = vector.load %arg8[%c0_18, %c0_19] : memref<8x16xf32, #tpu.memory_space<vmem>>, vector<8x16xf32>
    %cst_20 = arith.constant dense<0.000000e+00> : vector<8x128xf32>
    %23 = tpu.matmul %22, %21, %cst_20 {dimension_numbers = #tpu.dot_dimension_numbers<[1], [0], [0], [1], [0, 0, 1, 1], [], []>} : vector<8x16xf32>, vector<16x128xf32>, vector<8x128xf32> -> vector<8x128xf32>
    %c0_21 = arith.constant 0 : index
    %c0_22 = arith.constant 0 : index
    %24 = vector.load %arg9[%c0_21, %c0_22] : memref<8x1xf32, #tpu.memory_space<vmem>>, vector<8x1xf32>
    %25 = vector.broadcast %24 : vector<8x1xf32> to vector<8x128xf32>
    %26 = arith.addf %23, %25 : vector<8x128xf32>
    %c0_23 = arith.constant 0 : index
    %c0_24 = arith.constant 0 : index
    %27 = vector.load %arg10[%c0_23, %c0_24] : memref<8x128xf32, #tpu.memory_space<vmem>>, vector<8x128xf32>
    tpu.vector_store %arg10[%c0_23, %c0_24], %26 {strides = array<i32>} : memref<8x128xf32, #tpu.memory_space<vmem>>, vector<8x128xf32>,
    return
  }
  func.func @transform_0(%arg0: i32) -> (i32, i32) {
    %c0_i32 = arith.constant 0 : i32
    %c0_i32_0 = arith.constant 0 : i32
    return %c0_i32, %arg0 : i32, i32
  }
  func.func @transform_1(%arg0: i32) -> (i32, i32) {
    %c0_i32 = arith.constant 0 : i32
    %c0_i32_0 = arith.constant 0 : i32
    %c0_i32_1 = arith.constant 0 : i32
    return %c0_i32, %c0_i32_0 : i32, i32
  }
  func.func @transform_2(%arg0: i32) -> (i32, i32) {
    %c0_i32 = arith.constant 0 : i32
    %c0_i32_0 = arith.constant 0 : i32
    %c0_i32_1 = arith.constant 0 : i32
    return %c0_i32, %c0_i32_0 : i32, i32
  }
  func.func @transform_3(%arg0: i32) -> (i32, i32) {
    %c0_i32 = arith.constant 0 : i32
    %c0_i32_0 = arith.constant 0 : i32
    %c0_i32_1 = arith.constant 0 : i32
    return %c0_i32, %c0_i32_0 : i32, i32
  }
  func.func @transform_4(%arg0: i32) -> (i32, i32) {
    %c0_i32 = arith.constant 0 : i32
    %c0_i32_0 = arith.constant 0 : i32
    %c0_i32_1 = arith.constant 0 : i32
    return %c0_i32, %c0_i32_0 : i32, i32
  }
  func.func @transform_5(%arg0: i32) -> (i32, i32) {
    %c0_i32 = arith.constant 0 : i32
    %c0_i32_0 = arith.constant 0 : i32
    %c0_i32_1 = arith.constant 0 : i32
    return %c0_i32, %c0_i32_0 : i32, i32
  }
  func.func @transform_6(%arg0: i32) -> (i32, i32) {
    %c0_i32 = arith.constant 0 : i32
    %c0_i32_0 = arith.constant 0 : i32
    %c0_i32_1 = arith.constant 0 : i32
    return %c0_i32, %c0_i32_0 : i32, i32
  }
  func.func @transform_7(%arg0: i32) -> (i32, i32) {
    %c0_i32 = arith.constant 0 : i32
    %c0_i32_0 = arith.constant 0 : i32
    %c0_i32_1 = arith.constant 0 : i32
    return %c0_i32, %c0_i32_0 : i32, i32
  }
  func.func @transform_8(%arg0: i32) -> (i32, i32) {
    %c0_i32 = arith.constant 0 : i32
    %c0_i32_0 = arith.constant 0 : i32
    %c0_i32_1 = arith.constant 0 : i32
    return %c0_i32, %c0_i32_0 : i32, i32
  }
  func.func @transform_9(%arg0: i32) -> (i32, i32) {
    %c0_i32 = arith.constant 0 : i32
    %c0_i32_0 = arith.constant 0 : i32
    return %c0_i32, %arg0 : i32, i32
  }
}

</mosaic_0001>

<bundles_post_ra>
// kernel: fdem1d_inversion_forward.1
= control target key start
LH: loop header
LB: loop body
LE: loop exit
PB: predicated region body
PF: predicated region fallthrough
CT: control target
= control target key end

     0   :  { %vm62_vm0 = vcmask 130048   ;;  %v581_v3 = vmov 0   ;;  %vm192_vm1 = vcmask 261120   ;;  %v582_v61 = vmov 0.0|0.0   ;;  %s721_s0 = inlined_call_operand.vmem [shape: f32[16,10], index: 0, kind: input, shape index: {}]   ;;  %s722_s1 = inlined_call_operand.vmem [shape: f32[32,16], index: 1, kind: input, shape index: {}]   ;;  %s723_s2 = inlined_call_operand.vmem [shape: f32[32,1], index: 2, kind: input, shape index: {}]   ;;  %s724_s4 = inlined_call_operand.vmem [shape: f32[32,1], index: 4, kind: input, shape index: {}]   ;;  %s725_s6 = inlined_call_operand.vmem [shape: f32[16,1], index: 6, kind: input, shape index: {}]   ;;  %s726_s8 = inlined_call_operand.vmem [shape: f32[8,1], index: 8, kind: input, shape index: {}]   ;;  %s727_s3 = inlined_call_operand.vmem [shape: f32[32,32], index: 3, kind: input, shape index: {}]   ;;  %s728_s5 = inlined_call_operand.vmem [shape: f32[16,32], index: 5, kind: input, shape index: {}]   ;;  %s729_s7 = inlined_call_operand.vmem [shape: f32[8,16], index: 7, kind: input, shape index: {}]   ;;  %s730_s9 = inlined_call_operand.vmem [shape: f32[8,10], index: 9, kind: output, shape index: {}]  }
   0x1   :  { %v32_v0 = vld [vmem:[%s721_s0] sm:$0xff]  ;;  %v33_v1 = vld [vmem:[%s721_s0 + $0x8] sm:$0xff]  ;;  %579 = vset.pattern.permute.xlu0 %v581_v3  ;;  %580 = vset.pattern.permute.xlu1 %v581_v3  ;;  %v40_v6 = vld [vmem:[%s723_s2 + $0x10] sm:$0xff]  ;;  %vm583_vm2 = vmmov 0   ;;  %v584_v62 = vmov 0.0  }
   0x2   :  { %v34_v2 = vld [vmem:[%s722_s1] sm:$0xff]  ;;  %v552_v4 = vpack.c.bf16 %v33_v1, %v32_v0  ;;  %v35_v7 = vld [vmem:[%s722_s1 + $0x8] sm:$0xff]  ;;  %54 = vperm.xlu1 %580, %v40_v6   ;;  %v36_v9 = vld [vmem:[%s722_s1 + $0x10] sm:$0xff] }
   0x3   :  { %514 = vmatprep.mubr.msk.f32.mxu0 %vm62_vm0, %v34_v2  ;;  %v38_v5 = vld [vmem:[%s723_s2] sm:$0xff]  ;;  %v39_v8 = vld [vmem:[%s723_s2 + $0x8] sm:$0xff]  ;;  %v41_v10 = vld [vmem:[%s723_s2 + $0x18] sm:$0xff] }
   0x4   :  { %553 = vmatprep.subr.bf16.mxu0 %v552_v4  ;;  %44 = vperm.xlu0 %579, %v38_v5   ;;  %v37_v11 = vld [vmem:[%s722_s1 + $0x18] sm:$0xff]  ;;  %v168_v12 = vld [vmem:[%s724_s4] sm:$0xff]  ;;  %v169_v13 = vld [vmem:[%s724_s4 + $0x8] sm:$0xff] }
   0x5   :  { %555 = vmatpush3.bf16.msra.mxu0 %v552_v4  ;;  %v170_v14 = vld [vmem:[%s724_s4 + $0x10] sm:$0xff]  ;;  %v171_v15 = vld [vmem:[%s724_s4 + $0x18] sm:$0xff]  ;;  %v296_v16 = vld [vmem:[%s725_s6] sm:$0xff] }
   0x6   :  { %59 = vperm.xlu1 %580, %v41_v10   ;;  %v297_v17 = vld [vmem:[%s725_s6 + $0x8] sm:$0xff]  ;;  %v392_v18 = vld [vmem:[%s726_s8] sm:$0xff]  ;;  %v166_v39 = vld [vmem:[%s727_s3 + $0x10] sm:$0xff] }
   0x7   :  { %v164_v19 = vld [vmem:[%s727_s3] sm:$0xff]  ;;  %v165_v38 = vld [vmem:[%s727_s3 + $0x8] sm:$0xff]  ;;  %v167_v40 = vld [vmem:[%s727_s3 + $0x18] sm:$0xff] }
   0x8   :  { %515 = vmatmul.mubr.msk.f32.vlgmr.msra.gmra.mrb[0].mxu0 %vm62_vm0, %v35_v7  ;;  %49 = vperm.xlu0 %579, %v39_v8   ;;  %v294_v41 = vld [vmem:[%s728_s5] sm:$0xff]  ;;  %v295_v60 = vld [vmem:[%s728_s5 + $0x8] sm:$0xff] }
   0x9   :  { %517 = vmatprep.mubr.msk.f32.mxu0 %vm62_vm0, %v36_v9  ;;  %528 = vmatprep.mubr.msk.f32.mxu1 %vm192_vm1, %v164_v19  ;;  %v391_v8 = vld [vmem:[%s729_s7] sm:$0xff] }
   0xa   :  { %179 = vperm.xlu1 %580, %v169_v13  }
   0xc   :  { %518 = vmatmul.mubr.msk.f32.gmra.mrb[2].mxu0 %vm62_vm0, %v37_v11  ;;  %174 = vperm.xlu0 %579, %v168_v12  }
   0xd   :  { %542 = vmatprep.mubr.msk.f32.mxu0 %vm192_vm1, %v294_v41 }
   0xe   :  { %189 = vperm.xlu1 %580, %v171_v15  }
  0x10   :  { %184 = vperm.xlu0 %579, %v170_v14  }
  0x12   :  { %305 = vperm.xlu1 %580, %v297_v17  }
  0x14   :  { %300 = vperm.xlu0 %579, %v296_v16  }
  0x18   :  { %395 = vperm.xlu0 %579, %v392_v18  }
  0x81   :  { %v55_v21 = vpop.permute.xlu1 %54 }
  0x83   :  { %v45_v20 = vpop.permute.xlu0 %44 }
  0x85   :  { %v60_v28 = vpop.permute.xlu1 %59 }
  0x87   :  { %v50_v22 = vpop.permute.xlu0 %49 }
  0x89   :  { %v180_v42 = vpop.permute.xlu1 %179 }
  0x8b   :  { %v175_v43 = vpop.permute.xlu0 %174 }
  0x8d   :  { %v190_v49 = vpop.permute.xlu1 %189 }
  0x8f   :  { %v185_v52 = vpop.permute.xlu0 %184 }
  0x91   :  { %v306_v63 = vpop.permute.xlu1 %305 }
  0x93   :  { %v301_v1 = vpop.permute.xlu0 %300 }
  0x97   :  { %v396_v9 = vpop.permute.xlu0 %395 }
  0xdb   :  { %v516_v23 = vpop.f32.mrb[0].mxu0 }
  0xdc   :  { %v147_v24 = vadd.f32 %v516_v23, %v50_v22  ;;  %v141_v25 = vpop.f32.mrb[1].mxu0 }
  0xdd   :  { %v142_v26 = vadd.f32 %v141_v25, %v45_v20 }
  0xde   :  { %v161_v27 = vmax.f32 %v147_v24, 0.0 }
  0xdf   :  { %v160_v29 = vmax.f32 %v142_v26, 0.0  ;;  %v519_v30 = vpop.f32.mrb[2].mxu0 }
  0xe0   :  { %v157_v31 = vadd.f32 %v519_v30, %v60_v28  ;;  %v151_v32 = vpop.f32.mrb[3].mxu0 }
  0xe1   :  { %v152_v33 = vadd.f32 %v151_v32, %v55_v21  ;;  %v556_v34 = vpack.c.bf16 %v161_v27, %v160_v29 }
  0xe2   :  { %v163_v35 = vmax.f32 %v157_v31, 0.0 }
  0xe3   :  { %v162_v36 = vmax.f32 %v152_v33, 0.0  ;;  %557 = vmatprep.subr.bf16.mxu1 %v556_v34 }
  0xe4   :  { %559 = vmatpush3.bf16.msra.mxu1 %v556_v34 }
  0xe5   :  { %v560_v37 = vpack.c.bf16 %v163_v35, %v162_v36 }
  0xe7   :  { %561 = vmatprep.subr.bf16.mxu1 %v560_v37 }
  0xe8   :  { %563 = vmatpush3.bf16.msra.mxu1 %v560_v37 }
  0xeb   :  { %529 = vmatmul.mubr.msk.f32.vlgmr.msra.gmra.mrb[0].mxu1 %vm192_vm1, %v165_v38 }
  0xec   :  { %531 = vmatprep.mubr.msk.f32.mxu1 %vm192_vm1, %v166_v39 }
  0xef   :  { %532 = vmatmul.mubr.msk.f32.gmra.mrb[2].mxu1 %vm192_vm1, %v167_v40 }
 0x1be   :  { %v530_v44 = vpop.f32.mrb[0].mxu1 }
 0x1bf   :  { %v277_v45 = vadd.f32 %v530_v44, %v180_v42  ;;  %v271_v46 = vpop.f32.mrb[1].mxu1 }
 0x1c0   :  { %v272_v47 = vadd.f32 %v271_v46, %v175_v43 }
 0x1c1   :  { %v291_v48 = vmax.f32 %v277_v45, 0.0 }
 0x1c2   :  { %v290_v50 = vmax.f32 %v272_v47, 0.0  ;;  %v533_v51 = vpop.f32.mrb[2].mxu1 }
 0x1c3   :  { %v287_v53 = vadd.f32 %v533_v51, %v190_v49  ;;  %v281_v54 = vpop.f32.mrb[3].mxu1 }
 0x1c4   :  { %v564_v55 = vpack.c.bf16 %v291_v48, %v290_v50  ;;  %v282_v56 = vadd.f32 %v281_v54, %v185_v52 }
 0x1c5   :  { %v293_v57 = vmax.f32 %v287_v53, 0.0 }
 0x1c6   :  { %v292_v58 = vmax.f32 %v282_v56, 0.0  ;;  %565 = vmatprep.subr.bf16.mxu0 %v564_v55 }
 0x1c7   :  { %567 = vmatpush3.bf16.msra.mxu0 %v564_v55 }
 0x1c8   :  { %v568_v59 = vpack.c.bf16 %v293_v57, %v292_v58 }
 0x1ca   :  { %569 = vmatprep.subr.bf16.mxu0 %v568_v59 }
 0x1cb   :  { %571 = vmatpush3.bf16.msra.mxu0 %v568_v59 }
 0x1cc   :  { %572 = vmatprep.subr.bf16.mxu0 %v582_v61 }
 0x1ce   :  { %543 = vmatmul.mubr.msk.f32.vlgmr.msra.gmra.mrb[4].mxu0 %vm192_vm1, %v295_v60 }
 0x1cf   :  { %549 = vmatprep.mubr.msk.f32.mxu0 %vm583_vm2, %v584_v62 }
 0x2a1   :  { %v544_v0 = vpop.f32.mrb[4].mxu0 }
 0x2a2   :  { %v386_v2 = vadd.f32 %v544_v0, %v306_v63  ;;  %v380_v3 = vpop.f32.mrb[5].mxu0 }
 0x2a3   :  { %v381_v4 = vadd.f32 %v380_v3, %v301_v1 }
 0x2a4   :  { %v390_v5 = vmax.f32 %v386_v2, 0.0 }
 0x2a5   :  { %v389_v6 = vmax.f32 %v381_v4, 0.0 }
 0x2a7   :  { %v573_v7 = vpack.c.bf16 %v390_v5, %v389_v6 }
 0x2a9   :  { %574 = vmatpush3.bf16.msra.mxu0 %v573_v7 }
 0x2ac   :  { %550 = vmatmul.mubr.msk.f32.vlgmr.msra.gmra.mrb[6].mxu0 %vm62_vm0, %v391_v8 }
 0x37f   :  { %v467_v10 = vpop.f32.mrb[6].mxu0 }
 0x380   :  { %v468_v11 = vadd.f32 %v467_v10, %v396_v9  ;;  %v551_v12 = vpop.f32.mrb[7].mxu0 }
 0x382   :  { %471 = vst [vmem:[%s730_s9] sm:$0xff] %v468_v11 }

</bundles_post_ra>
